<compile_context>
chip_gen: v6e
topology: v6e:2x2x1
jax: 0.10.0
libtpu: 0.0.40
codegen_flags: <defaults>
</compile_context>

<pallas_src>
import jax
import jax.numpy as jnp
from jax import lax
from jax.experimental import pallas as pl
from jax.experimental.pallas import tpu as pltpu


def _sdpa_kernel(x_ref, w_qkv_ref, b_qkv_ref, o_ref):
    D = o_ref.shape[1]                      # 16

    x = x_ref[...]                          # (12, 16) f32
    w = w_qkv_ref[...]                      # (48, 16) f32, rows = [10*w1; w2; w3]
    b = b_qkv_ref[...]                      # (1, 48)  f32, cols = [10*b1, b2, b3]

    # Single fused projection: x @ W^T via contracting dim 1 of both operands
    # (no transpose materialized).
    qkv = lax.dot_general(
        x, w,
        dimension_numbers=(((1,), (1,)), ((), ())),
        preferred_element_type=jnp.float32,
    ) + b                                   # (12, 48)

    q = qkv[:, 0 * D:1 * D]                 # already carries the 10.0 scale
    k = qkv[:, 1 * D:2 * D]
    v = qkv[:, 2 * D:3 * D]

    # temp2 = (q @ k^T)^T = k @ q^T ; contract dim 1 of both -> no transpose.
    s = lax.dot_general(
        k, q,
        dimension_numbers=(((1,), (1,)), ((), ())),
        preferred_element_type=jnp.float32,
    )                                       # (12, 12)

    # Numerically-stable softmax over the last axis.
    s = s - jnp.max(s, axis=-1, keepdims=True)
    p = jnp.exp(s)
    d = jnp.sum(p, axis=-1, keepdims=True)
    r = pl.reciprocal(d, approx=True)       # EUP vrcp
    r = r * (2.0 - d * r)                   # one Newton step -> ~f32 accuracy
    a = p * r

    o_ref[...] = jnp.dot(a, v, preferred_element_type=jnp.float32)


def model_forward(x, w1, b1, w2, b2, w3, b3):
    """x: (12, 16); w*: PyTorch-style (out, in); b*: (out,)."""
    M, _ = x.shape
    D = w1.shape[0]

    # Fold the 10.0 attention scale into the q projection and fuse QKV.
    # Weights stay in (out, in) layout (no transposes in the wrapper).
    w_qkv = jnp.concatenate([10.0 * w1, w2, w3], axis=0).astype(jnp.float32)      # (3D, D_in)
    b_qkv = jnp.concatenate([10.0 * b1, b2, b3], axis=0).reshape(1, 3 * D)
    b_qkv = b_qkv.astype(jnp.float32)                                             # (1, 3D)

    vmem = pl.BlockSpec(memory_space=pltpu.MemorySpace.VMEM)
    return pl.pallas_call(
        _sdpa_kernel,
        out_shape=jax.ShapeDtypeStruct((M, D), jnp.float32),
        in_specs=[vmem, vmem, vmem],
        out_specs=vmem,
    )(x.astype(jnp.float32), w_qkv, b_qkv)


def _reference(x, w1, b1, w2, b2, w3, b3):
    q = x @ w1.T + b1
    k = x @ w2.T + b2
    v = x @ w3.T + b3
    temp = q @ k.T
    temp2 = temp.T
    a = jax.nn.softmax(10.0 * temp2, axis=-1)
    return a @ v


if __name__ == "__main__":
    key = jax.random.PRNGKey(0)
    kx, k1, k2, k3, kb1, kb2, kb3 = jax.random.split(key, 7)

    x1 = jax.random.normal(kx, (12, 16), dtype=jnp.float32)

    # Deterministic "Linear(16,16)" parameters (uniform in [-1/sqrt(16), 1/sqrt(16)])
    bound = 1.0 / jnp.sqrt(16.0)
    w1 = jax.random.uniform(k1, (16, 16), minval=-bound, maxval=bound)
    w2 = jax.random.uniform(k2, (16, 16), minval=-bound, maxval=bound)
    w3 = jax.random.uniform(k3, (16, 16), minval=-bound, maxval=bound)
    b1 = jax.random.uniform(kb1, (16,), minval=-bound, maxval=bound)
    b2 = jax.random.uniform(kb2, (16,), minval=-bound, maxval=bound)
    b3 = jax.random.uniform(kb3, (16,), minval=-bound, maxval=bound)

    out = model_forward(x1, w1, b1, w2, b2, w3, b3)
    jax.block_until_ready(out)

    ref = _reference(x1, w1, b1, w2, b2, w3, b3)
    assert out.shape == (12, 16)
    assert jnp.allclose(out, ref, atol=1e-4, rtol=1e-4)

    print("KERNEL_OK")
</pallas_src>

<mosaic_0001>
module attributes {stable_mosaic.version = 11 : i64} {
  func.func @_sdpa_kernel(%arg0: memref<12x16xf32, #tpu.memory_space<vmem>>, %arg1: memref<48x16xf32, #tpu.memory_space<vmem>>, %arg2: memref<1x48xf32, #tpu.memory_space<vmem>>, %arg3: memref<12x16xf32, #tpu.memory_space<vmem>>) attributes {dimension_semantics = [], scalar_prefetch = 0 : i64, scratch_operands = 0 : i64, tpu.core_type = #tpu.core_type<tc>} {
    %c0 = arith.constant 0 : index
    %c0_0 = arith.constant 0 : index
    %0 = vector.load %arg0[%c0, %c0_0] : memref<12x16xf32, #tpu.memory_space<vmem>>, vector<12x16xf32>
    %c0_1 = arith.constant 0 : index
    %c0_2 = arith.constant 0 : index
    %1 = vector.load %arg1[%c0_1, %c0_2] : memref<48x16xf32, #tpu.memory_space<vmem>>, vector<48x16xf32>
    %c0_3 = arith.constant 0 : index
    %c0_4 = arith.constant 0 : index
    %2 = vector.load %arg2[%c0_3, %c0_4] : memref<1x48xf32, #tpu.memory_space<vmem>>, vector<1x48xf32>
    %cst = arith.constant dense<0.000000e+00> : vector<12x48xf32>
    %3 = tpu.matmul %0, %1, %cst {dimension_numbers = #tpu.dot_dimension_numbers<[1], [1], [0], [0], [0, 0, 1, 0], [], []>} : vector<12x16xf32>, vector<48x16xf32>, vector<12x48xf32> -> vector<12x48xf32>
    %4 = vector.broadcast %2 : vector<1x48xf32> to vector<12x48xf32>
    %5 = arith.addf %3, %4 : vector<12x48xf32>
    %6 = vector.extract_strided_slice %5 {offsets = [0, 0], sizes = [12, 16], strides = [1, 1]} : vector<12x48xf32> to vector<12x16xf32>
    %7 = vector.extract_strided_slice %5 {offsets = [0, 16], sizes = [12, 16], strides = [1, 1]} : vector<12x48xf32> to vector<12x16xf32>
    %8 = vector.extract_strided_slice %5 {offsets = [0, 32], sizes = [12, 16], strides = [1, 1]} : vector<12x48xf32> to vector<12x16xf32>
    %cst_5 = arith.constant dense<0.000000e+00> : vector<12x12xf32>
    %9 = tpu.matmul %7, %6, %cst_5 {dimension_numbers = #tpu.dot_dimension_numbers<[1], [1], [0], [0], [0, 0, 1, 0], [], []>} : vector<12x16xf32>, vector<12x16xf32>, vector<12x12xf32> -> vector<12x12xf32>
    %cst_6 = arith.constant dense<0xFF800000> : vector<12xf32>
    %10 = vector.multi_reduction <maximumf>, %9, %cst_6 [1] : vector<12x12xf32> to vector<12xf32>
    %11 = vector.shape_cast %10 : vector<12xf32> to vector<12x1xf32>
    %12 = vector.broadcast %11 : vector<12x1xf32> to vector<12x12xf32>
    %13 = arith.subf %9, %12 : vector<12x12xf32>
    %14 = math.exp %13 : vector<12x12xf32>
    %cst_7 = arith.constant dense<0.000000e+00> : vector<12xf32>
    %15 = vector.multi_reduction <add>, %14, %cst_7 [1] : vector<12x12xf32> to vector<12xf32>
    %16 = vector.shape_cast %15 : vector<12xf32> to vector<12x1xf32>
    %17 = tpu.reciprocal %16 {approx = true} : vector<12x1xf32> -> vector<12x1xf32>
    %18 = arith.mulf %16, %17 : vector<12x1xf32>
    %cst_8 = arith.constant 2.000000e+00 : f32
    %19 = vector.broadcast %cst_8 : f32 to vector<12x1xf32>
    %20 = arith.subf %19, %18 : vector<12x1xf32>
    %21 = arith.mulf %17, %20 : vector<12x1xf32>
    %22 = vector.broadcast %21 : vector<12x1xf32> to vector<12x12xf32>
    %23 = arith.mulf %14, %22 : vector<12x12xf32>
    %cst_9 = arith.constant dense<0.000000e+00> : vector<12x16xf32>
    %24 = tpu.matmul %23, %8, %cst_9 {dimension_numbers = #tpu.dot_dimension_numbers<[1], [0], [0], [1], [0, 0, 1, 1], [], []>} : vector<12x12xf32>, vector<12x16xf32>, vector<12x16xf32> -> vector<12x16xf32>
    %c0_10 = arith.constant 0 : index
    %c0_11 = arith.constant 0 : index
    %25 = vector.load %arg3[%c0_10, %c0_11] : memref<12x16xf32, #tpu.memory_space<vmem>>, vector<12x16xf32>
    tpu.vector_store %arg3[%c0_10, %c0_11], %24 {strides = array<i32>} : memref<12x16xf32, #tpu.memory_space<vmem>>, vector<12x16xf32>,
    return
  }
}

</mosaic_0001>

<bundles_post_ra>
// kernel: tpu_custom_call.1
= control target key start
LH: loop header
LB: loop body
LE: loop exit
PB: predicated region body
PF: predicated region fallthrough
CT: control target
= control target key end

     0   :  { %vm30_vm0 = vcmask 130048   ;;  %s533_s0 = inlined_call_operand.vmem [shape: f32[12,16], index: 0, kind: input, shape index: {}]   ;;  %s534_s1 = inlined_call_operand.vmem [shape: f32[48,16], index: 1, kind: input, shape index: {}]   ;;  %s535_s2 = inlined_call_operand.vmem [shape: f32[1,48], index: 2, kind: input, shape index: {}]   ;;  %s536_s3 = inlined_call_operand.hbm [shape: f32[12,16], index: 3, kind: output, shape index: {}]  }
   0x1   :  { %v22_v0 = vld [vmem:[%s534_s1 + $0x28] sm:$0xff]  ;;  %v21_v1 = vld [vmem:[%s534_s1 + $0x20] sm:$0xff] }
   0x2   :  { %389 = vmatprep.subr.msk.mxu0 %vm30_vm0, %v22_v0  ;;  %v15_v2 = vld [vmem:[%s533_s0] sm:$0xff] }
   0x3   :  { %390 = vmatpush3.xpose.msk.msra.mxu0 %vm30_vm0, %v22_v0 }
   0x4   :  { %8 = vsyncpa [#allocation3], 0  ;;  %391 = vmatprep.subr.msk.mxu0 %vm30_vm0, %v21_v1  ;;  %401 = vmatprep.mubr.msk.f32.mxu0 %vm30_vm0, %v15_v2  ;;  %v20_v3 = vld [vmem:[%s534_s1 + $0x18] sm:$0xff]  ;;  %v19_v4 = vld [vmem:[%s534_s1 + $0x10] sm:$0xff]  ;;  %vm219_vm1 = vcmask 97280   ;;  %vm223_vm2 = vcmask 93184  }
   0x5   :  { %v18_v5 = vld [vmem:[%s534_s1 + $0x8] sm:$0xff]  ;;  %v17_v6 = vld [vmem:[%s534_s1] sm:$0xff]  ;;  %s453_s1 = smov 112   ;;  %vm260_vm3 = vcmask 1043456   ;;  %vm339_vm4 = vcmask 125952  }
   0x6   :  { %v16_v7 = vld [vmem:[%s533_s0 + $0x8] sm:$0xf]  ;;  %v357_v8 = vld [vmem:[%s535_s2] ss:$0 sm:$0xff]  ;;  %s454_s0 = smov 96   ;;  %s455_s2 = smov [#allocation2]  }
   0x7   :  { %392 = vmatpush3.xpose.msk.msra.mxu0 %vm30_vm0, %v21_v1  ;;  %s346_s30 = sshll.u32 %s455_s2, 4  ;;  %s347_s30 = int_to_ptr.vmem [resolvable:$true] %s346_s30 }
   0x8   :  { %393 = vmatprep.subr.msk.mxu0 %vm30_vm0, %v20_v3  ;;  %s431_s4 = scalar_lea.vmem %s347_s30, 256  ;;  %p436_p1 = scmp.lt.s32.totalorder %s347_s30, %s347_s30 }
   0x9   :  { %p432_p0 = scmp.ne.s32.totalorder %s347_s30, %s431_s4  ;;  %p437_p2 = scmp.lt.s32.totalorder %s431_s4, %s431_s4 }
   0xb   :  { %394 = vmatpush3.xpose.msk.msra.mxu0 %vm30_vm0, %v20_v3  ;;  %p438_p3 = por %p437_p2, %p436_p1 }
   0xc   :  { %395 = vmatprep.subr.msk.mxu0 %vm30_vm0, %v19_v4 }
   0xd   :  { %p439_p4 = pnand %p438_p3, %p432_p0 }
   0xf   :  { %396 = vmatpush3.xpose.msk.msra.mxu0 %vm30_vm0, %v19_v4 }
  0x10   :  { %397 = vmatprep.subr.msk.mxu0 %vm30_vm0, %v18_v5 }
  0x13   :  { %398 = vmatpush3.xpose.msk.msra.mxu0 %vm30_vm0, %v18_v5 }
  0x14   :  { %399 = vmatprep.subr.msk.mxu0 %vm30_vm0, %v17_v6 }
  0x17   :  { %400 = vmatpush3.xpose.msk.msra.mxu0 %vm30_vm0, %v17_v6 }
  0x1a   :  { %402 = vmatmul.mubr.msk.f32.vlgmr.msra.gmra.mxu0 %vm30_vm0, %v16_v7 }
  0xda   :  { %v403_v9 = vpop.f32.mrf.mxu0 }
  0xdb   :  { %v127_v10 = vadd.f32 %v403_v9, %v357_v8 }
  0xdc   :  { %v121_v11 = vpop.f32.mrf.mxu0 }
  0xdd   :  { %v122_v12 = vadd.f32 %v357_v8, %v121_v11  ;;  %404 = vmatprep.subr.msk.mxu1 %vm30_vm0, %v127_v10 }
  0xde   :  { %405 = vmatpush3.xpose.msk.msra.mxu1 %vm30_vm0, %v127_v10 }
  0xdf   :  { %132 = vrot.lane.b32.xlu0 %v122_v12, %s453_s1  ;;  %406 = vmatprep.subr.msk.mxu1 %vm30_vm0, %v122_v12 }
  0xe2   :  { %407 = vmatpush3.xpose.msk.msra.mxu1 %vm30_vm0, %v122_v12 }
  0xe3   :  { %134 = vrot.lane.b32.xlu0 %v127_v10, %s453_s1 }
 0x151   :  { %v133_v13 = vpop.permute.xlu0 %132 }
 0x152   :  { %408 = vmatprep.mubr.msk.f32.mxu1 %vm30_vm0, %v133_v13 }
 0x155   :  { %v135_v14 = vpop.permute.xlu0 %134 }
 0x156   :  { %409 = vmatmul.mubr.msk.f32.vlgmr.msra.gmra.mxu1 %vm30_vm0, %v135_v14 }
 0x216   :  { %v410_v15 = vpop.f32.mrf.mxu1 }
 0x217   :  { %v224_v18 = vsel %vm223_vm2, %v410_v15, -inf }
 0x218   :  { %v210_v16 = vpop.f32.mrf.mxu1 }
 0x219   :  { %v220_v17 = vsel %vm219_vm1, %v210_v16, -inf }
 0x21a   :  { %221 = vmax.xlane.f32.xlu1 %v220_v17 }
 0x21e   :  { %225 = vmax.xlane.f32.xlu1 %v224_v18 }
 0x2a3   :  { %v222_v19 = vpop.xlane.xlu1 %221 }
 0x2a4   :  { %v227_v20 = vsub.f32 %v210_v16, %v222_v19 }
 0x2a6   :  { %v229_v21 = vmul.f32 1.442695, %v227_v20 }
 0x2a7   :  { %v226_v22 = vpop.xlane.xlu1 %225 }
 0x2a8   :  { %423 = vpow2.f32 %v229_v21  ;;  %v228_v23 = vsub.f32 %v410_v15, %v226_v22 }
 0x2aa   :  { %v231_v24 = vmul.f32 1.442695, %v228_v23 }
 0x2ac   :  { %425 = vpow2.f32 %v231_v24 }
 0x2b5   :  { %v424_v25 = vpop.eup %423 }
 0x2b6   :  { %v233_v26 = vsel %vm219_vm1, %v424_v25, 0.0 }
 0x2b7   :  { %234 = vadd.xlane.f32.xlu0 %v233_v26 }
 0x2b9   :  { %v426_v27 = vpop.eup %425 }
 0x2ba   :  { %v236_v28 = vsel %vm223_vm2, %v426_v27, 0.0 }
 0x2bb   :  { %237 = vadd.xlane.f32.xlu1 %v236_v28 }
 0x2cc   :  { %251 = vrot.lane.b32.xlu1 %v127_v10, %s454_s0 }
 0x2d0   :  { %249 = vrot.lane.b32.xlu1 %v122_v12, %s454_s0 }
 0x340   :  { %v235_v29 = vpop.xlane.xlu0 %234 }
 0x341   :  { %427 = vrcp.f32 %v235_v29 }
 0x344   :  { %v238_v30 = vpop.xlane.xlu1 %237 }
 0x345   :  { %429 = vrcp.f32 %v238_v30 }
 0x348   :  { %v252_v31 = vpop.permute.xlu1 %251 }
 0x349   :  { %411 = vmatprep.subr.msk.mxu1 %vm260_vm3, %v252_v31 }
 0x34a   :  { %412 = vmatpush3.msk.msra.mxu1 %vm260_vm3, %v252_v31 }
 0x34c   :  { %v250_v32 = vpop.permute.xlu1 %249 }
 0x34d   :  { %413 = vmatprep.subr.mxu1 %v250_v32 }
 0x34e   :  { %v428_v33 = vpop.eup %427  ;;  %414 = vmatpush3.msra.mxu1 %v250_v32 }
 0x34f   :  { %v241_v34 = vmul.f32 %v428_v33, %v235_v29 }
 0x351   :  { %v243_v35 = vsub.f32 2.0, %v241_v34 }
 0x352   :  { %v430_v36 = vpop.eup %429 }
 0x353   :  { %v245_v37 = vmul.f32 %v428_v33, %v243_v35  ;;  %v242_v38 = vmul.f32 %v430_v36, %v238_v30 }
 0x355   :  { %v247_v39 = vmul.f32 %v424_v25, %v245_v37  ;;  %v244_v40 = vsub.f32 2.0, %v242_v38 }
 0x357   :  { %v246_v41 = vmul.f32 %v430_v36, %v244_v40  ;;  %415 = vmatprep.mubr.msk.f32.mxu1 %vm219_vm1, %v247_v39 }
 0x359   :  { %v248_v42 = vmul.f32 %v426_v27, %v246_v41 }
 0x35b   :  { %416 = vmatmul.mubr.msk.f32.vlgmr.msra.gmra.mxu1 %vm219_vm1, %v248_v42 }
 0x41b   :  { %v417_v43 = vpop.f32.mrf.mxu1 }
 0x41c   :  { %340 = vst.msk [vmem:[#allocation2 + $0x8] sm:$0xf] %vm339_vm4, %v417_v43 }
 0x41d   :  { %v329_v44 = vpop.f32.mrf.mxu1 }
 0x41e   :  { %338 = vst.msk [vmem:[#allocation2] sm:$0xff] %vm30_vm0, %v329_v44 }
 0x41f   :  { %442 = shalt.err (!%p439_p4)
}
 0x420   :  { %s456_s5 = smov 128   ;;  %s457_s6 = smov 8  }
 0x421   :  { %352 = dma.vmem_to_hbm [thread:$0]  %s347_s30, 256, %s536_s3, [#allocation3], %s456_s5, %s456_s5, %s457_s6  }
 0x422   :  { %451 = dma.done.wait [#allocation3], 256  }
 0x423   :  { %452 = vsyncadd [#allocation3], 4294967040 }
 0x424   :  { %356 = vsyncpa [#allocation3], 1 }

</bundles_post_ra>
